<compile_context>
chip_gen: v5e
topology: v5e:2x2
jax: 0.10.0
libtpu: 0.0.40
codegen_flags: <defaults>
</compile_context>

<pallas_src>
import math

import jax
import jax.numpy as jnp
from jax import lax
from jax.experimental import pallas as pl
from jax.experimental.pallas import tpu as pltpu

# ---- small synthetic config (consistent with a LLaMA-style decoder layer) ----
BATCH = 1
SEQ = 8
HIDDEN = 32
NUM_HEADS = 4
HEAD_DIM = HIDDEN // NUM_HEADS          # 8
NUM_KV_HEADS = 2                        # GQA
GROUP = NUM_HEADS // NUM_KV_HEADS       # 2
INTERMEDIATE = 64
RMS_EPS = 1e-6
ROPE_BASE = 10000.0

Q_W = NUM_HEADS * HEAD_DIM              # 32
KV_W = NUM_KV_HEADS * HEAD_DIM          # 16
NEG_INF = -1e9


def _rmsnorm(x, w):
    var = jnp.mean(x * x, axis=-1, keepdims=True)
    return x * jax.lax.rsqrt(var + RMS_EPS) * w


def block_kernel(x_ref, mask_ref, cos_ref, sin_ref,
                 ln1_ref, wqkv_ref, wo_ref, ln2_ref, wgu_ref, wd_ref,
                 out_ref, k_out_ref, v_out_ref):
    x = x_ref[...]                                         # (S, H)

    # ---- fused projection: [q | k | v | rotate_half(q) | rotate_half(k)] ----
    xn = _rmsnorm(x, ln1_ref[...])                         # input_layernorm
    proj = jnp.dot(xn, wqkv_ref[...], preferred_element_type=jnp.float32)  # (S, 112)
    qk = proj[:, :Q_W + KV_W]                              # (S, 48) pre-RoPE  q|k
    v = proj[:, Q_W + KV_W:Q_W + 2 * KV_W]                 # (S, 16)
    qk_rot = proj[:, Q_W + 2 * KV_W:]                      # (S, 48) rotate_half(q|k)

    qk = qk * cos_ref[...] + qk_rot * sin_ref[...]         # RoPE: pure elementwise
    q = qk[:, :Q_W]                                        # (S, 32)
    k = qk[:, Q_W:]                                        # (S, 16)

    # KV-cache outputs: post-RoPE keys, raw values (one contiguous store each).
    k_out_ref[...] = k
    v_out_ref[...] = v

    # ---- attention: stack heads along rows -> one matmul / softmax / matmul ----
    d = HEAD_DIM
    q_stk = jnp.concatenate(
        [q[:, h * d:(h + 1) * d] for h in range(NUM_HEADS)], axis=0)          # (NH*S, D)
    k_stk = jnp.concatenate(
        [k[:, (h // GROUP) * d:((h // GROUP) + 1) * d] for h in range(NUM_HEADS)],
        axis=0)                                                               # GQA repeat
    v_stk = jnp.concatenate(
        [v[:, (h // GROUP) * d:((h // GROUP) + 1) * d] for h in range(NUM_HEADS)],
        axis=0)

    scale = 1.0 / math.sqrt(HEAD_DIM)
    # q_stk @ k_stk^T expressed via dot_general (no transposed copy materialized).
    s = lax.dot_general(q_stk, k_stk, (((1,), (1,)), ((), ())),
                        preferred_element_type=jnp.float32) * scale + mask_ref[...]
    m = jnp.max(s, axis=-1, keepdims=True)
    p = jnp.exp(s - m)
    p = p * pl.reciprocal(jnp.sum(p, axis=-1, keepdims=True), approx=True)
    o_stk = jnp.dot(p, v_stk, preferred_element_type=jnp.float32)             # (NH*S, D)

    attn = jnp.concatenate(
        [o_stk[h * SEQ:(h + 1) * SEQ, :] for h in range(NUM_HEADS)], axis=1)  # (S, H)
    attn = jnp.dot(attn, wo_ref[...], preferred_element_type=jnp.float32)
    h1 = x + attn                                                             # residual

    # ---- MLP: fused gate|up (lane-dense 128-wide), SiLU, down ----
    hn = _rmsnorm(h1, ln2_ref[...])                        # post_attention_layernorm
    gu = jnp.dot(hn, wgu_ref[...], preferred_element_type=jnp.float32)        # (S, 128)
    g = gu[:, :INTERMEDIATE]
    u = gu[:, INTERMEDIATE:]
    mlp = jnp.dot(g * jax.nn.sigmoid(g) * u, wd_ref[...],
                  preferred_element_type=jnp.float32)
    out_ref[...] = h1 + mlp


def _full_spec(shape):
    return pl.BlockSpec(shape, lambda i, s=shape: (0,) * len(s))


def _fold_rotate_half(w_t, num_heads, head_dim):
    """Permute/negate columns of w_t so that x @ result == rotate_half(x @ w_t)."""
    half = head_dim // 2
    w3 = w_t.reshape(w_t.shape[0], num_heads, head_dim)
    w_rot = jnp.concatenate([-w3[..., half:], w3[..., :half]], axis=-1)
    return w_rot.reshape(w_t.shape)


@jax.jit
def block_forward(hidden_states, position_ids, attention_mask, cos, sin, params):
    """Mirrors Block.forward: returns (hidden_states, present_k, present_v).

    position_ids is unused (position_embeddings are precomputed), matching the
    reference module semantics.
    """
    del position_ids
    (ln1, wq, wk, wv, wo, ln2, wg, wu, wd) = params
    mask2d = attention_mask.reshape(SEQ, SEQ)              # HF (1,1,S,S) -> (S,S)

    # ---- host-side prep (cached once per model in a real deployment) ----
    w_qkv = jnp.concatenate(
        [wq.T, wk.T, wv.T,
         _fold_rotate_half(wq.T, NUM_HEADS, HEAD_DIM),
         _fold_rotate_half(wk.T, NUM_KV_HEADS, HEAD_DIM)], axis=1)            # (H, 112)
    w_gu = jnp.concatenate([wg.T, wu.T], axis=1)                              # (H, 128)
    cos_qk = jnp.concatenate([jnp.tile(cos, (1, NUM_HEADS)),
                              jnp.tile(cos, (1, NUM_KV_HEADS))], axis=1)      # (S, 48)
    sin_qk = jnp.concatenate([jnp.tile(sin, (1, NUM_HEADS)),
                              jnp.tile(sin, (1, NUM_KV_HEADS))], axis=1)
    # Block-diagonal mask for row-stacked attention: block (h, h') is the causal
    # mask when h == h' and fully masked otherwise (this also routes GQA groups).
    head_id = jnp.arange(NUM_HEADS * SEQ) // SEQ
    big_mask = jnp.where(head_id[:, None] == head_id[None, :],
                         jnp.tile(mask2d, (NUM_HEADS, NUM_HEADS)), NEG_INF)

    inputs = (hidden_states.reshape(SEQ, HIDDEN), big_mask, cos_qk, sin_qk,
              ln1.reshape(1, HIDDEN), w_qkv, wo.T,
              ln2.reshape(1, HIDDEN), w_gu, wd.T)
    out_shapes = (
        jax.ShapeDtypeStruct((SEQ, HIDDEN), jnp.float32),
        jax.ShapeDtypeStruct((SEQ, KV_W), jnp.float32),
        jax.ShapeDtypeStruct((SEQ, KV_W), jnp.float32),
    )
    out, k_flat, v_flat = pl.pallas_call(
        block_kernel,
        grid=(1,),
        in_specs=[_full_spec(a.shape) for a in inputs],
        out_specs=tuple(_full_spec(s.shape) for s in out_shapes),
        out_shape=out_shapes,
        compiler_params=pltpu.CompilerParams(dimension_semantics=("arbitrary",)),
    )(*inputs)

    present_k = k_flat.reshape(SEQ, NUM_KV_HEADS, HEAD_DIM).transpose(1, 0, 2)[None]
    present_v = v_flat.reshape(SEQ, NUM_KV_HEADS, HEAD_DIM).transpose(1, 0, 2)[None]
    return out.reshape(BATCH, SEQ, HIDDEN), present_k, present_v


# ---------------- pure-JAX reference (for sanity check) ----------------
def block_reference(x, mask, cos, sin, params):
    (ln1, wq, wk, wv, wo, ln2, wg, wu, wd) = params
    x2 = x.reshape(SEQ, HIDDEN)
    m = mask.reshape(SEQ, SEQ)

    def rms(v, w):
        return v * jax.lax.rsqrt(jnp.mean(v * v, -1, keepdims=True) + RMS_EPS) * w

    def rot(v):
        d = v.shape[-1]
        return jnp.concatenate([-v[..., d // 2:], v[..., :d // 2]], axis=-1)

    xn = rms(x2, ln1)
    q = (xn @ wq.T).reshape(SEQ, NUM_HEADS, HEAD_DIM).transpose(1, 0, 2)
    k = (xn @ wk.T).reshape(SEQ, NUM_KV_HEADS, HEAD_DIM).transpose(1, 0, 2)
    v = (xn @ wv.T).reshape(SEQ, NUM_KV_HEADS, HEAD_DIM).transpose(1, 0, 2)
    q = q * cos[None] + rot(q) * sin[None]
    k = k * cos[None] + rot(k) * sin[None]
    kr = jnp.repeat(k, GROUP, axis=0)
    vr = jnp.repeat(v, GROUP, axis=0)
    s = jnp.einsum('hqd,hkd->hqk', q, kr) / math.sqrt(HEAD_DIM) + m[None]
    p = jax.nn.softmax(s, -1)
    o = jnp.einsum('hqk,hkd->hqd', p, vr).transpose(1, 0, 2).reshape(SEQ, HIDDEN)
    h1 = x2 + o @ wo.T
    hn = rms(h1, ln2)
    g, u = hn @ wg.T, hn @ wu.T
    out = h1 + ((g * jax.nn.sigmoid(g)) * u) @ wd.T
    return out.reshape(1, SEQ, HIDDEN), k[None], v[None]


def rotary_cos_sin(seq, dim, base=ROPE_BASE):
    inv_freq = 1.0 / (base ** (jnp.arange(0, dim, 2, dtype=jnp.float32) / dim))
    pos = jnp.arange(seq, dtype=jnp.float32)
    freqs = pos[:, None] * inv_freq[None, :]
    emb = jnp.concatenate([freqs, freqs], axis=-1)
    return jnp.cos(emb), jnp.sin(emb)


if __name__ == "__main__":
    key = jax.random.PRNGKey(0)
    keys = jax.random.split(key, 10)

    # deterministic synthetic parameters (shapes from the module config)
    ln1 = jnp.ones((HIDDEN,), jnp.float32)
    ln2 = jnp.ones((HIDDEN,), jnp.float32)
    wq = 0.02 * jax.random.normal(keys[0], (NUM_HEADS * HEAD_DIM, HIDDEN), jnp.float32)
    wk = 0.02 * jax.random.normal(keys[1], (NUM_KV_HEADS * HEAD_DIM, HIDDEN), jnp.float32)
    wv = 0.02 * jax.random.normal(keys[2], (NUM_KV_HEADS * HEAD_DIM, HIDDEN), jnp.float32)
    wo = 0.02 * jax.random.normal(keys[3], (HIDDEN, NUM_HEADS * HEAD_DIM), jnp.float32)
    wg = 0.02 * jax.random.normal(keys[4], (INTERMEDIATE, HIDDEN), jnp.float32)
    wu = 0.02 * jax.random.normal(keys[5], (INTERMEDIATE, HIDDEN), jnp.float32)
    wd = 0.02 * jax.random.normal(keys[6], (HIDDEN, INTERMEDIATE), jnp.float32)
    params = (ln1, wq, wk, wv, wo, ln2, wg, wu, wd)

    # inputs (mirroring Block.forward's signature)
    hidden_states = jax.random.normal(keys[7], (BATCH, SEQ, HIDDEN), jnp.float32)
    position_ids = jnp.arange(SEQ, dtype=jnp.int32)[None, :]              # unused (as in ref)
    causal = jnp.tril(jnp.ones((SEQ, SEQ), jnp.bool_))
    attention_mask = jnp.where(causal, 0.0, NEG_INF).astype(jnp.float32).reshape(1, 1, SEQ, SEQ)

    # precomputed rotary embeddings (Block.__init__ does this with range(SEQ_LENGTH))
    cos, sin = rotary_cos_sin(SEQ, HEAD_DIM)

    out, pk, pv = block_forward(hidden_states, position_ids, attention_mask, cos, sin, params)
    jax.block_until_ready((out, pk, pv))

    ref_out, ref_k, ref_v = block_reference(hidden_states, attention_mask, cos, sin, params)
    assert jnp.allclose(out, ref_out, rtol=1e-2, atol=1e-2)
    assert jnp.allclose(pk, ref_k, rtol=1e-2, atol=1e-2)
    assert jnp.allclose(pv, ref_v, rtol=1e-2, atol=1e-2)

    print("KERNEL_OK")
</pallas_src>

<mosaic_0001>
module attributes {stable_mosaic.version = 11 : i64} {
  func.func @block_kernel(%arg0: i32, %arg1: memref<8x32xf32, #tpu.memory_space<vmem>>, %arg2: memref<32x32xf32, #tpu.memory_space<vmem>>, %arg3: memref<8x48xf32, #tpu.memory_space<vmem>>, %arg4: memref<8x48xf32, #tpu.memory_space<vmem>>, %arg5: memref<1x32xf32, #tpu.memory_space<vmem>>, %arg6: memref<32x112xf32, #tpu.memory_space<vmem>>, %arg7: memref<32x32xf32, #tpu.memory_space<vmem>>, %arg8: memref<1x32xf32, #tpu.memory_space<vmem>>, %arg9: memref<32x128xf32, #tpu.memory_space<vmem>>, %arg10: memref<64x32xf32, #tpu.memory_space<vmem>>, %arg11: memref<8x32xf32, #tpu.memory_space<vmem>>, %arg12: memref<8x16xf32, #tpu.memory_space<vmem>>, %arg13: memref<8x16xf32, #tpu.memory_space<vmem>>) attributes {dimension_semantics = [#tpu.dimension_semantics<arbitrary>], iteration_bounds = array<i64: 1>, scalar_prefetch = 0 : i64, scratch_operands = 0 : i64, tpu.core_type = #tpu.core_type<tc>, window_params = [{pipeline_mode = #tpu.pipeline_mode<synchronous>, transform_indices = @transform_0, window_bounds = array<i64: 8, 32>}, {pipeline_mode = #tpu.pipeline_mode<synchronous>, transform_indices = @transform_1, window_bounds = array<i64: 32, 32>}, {pipeline_mode = #tpu.pipeline_mode<synchronous>, transform_indices = @transform_2, window_bounds = array<i64: 8, 48>}, {pipeline_mode = #tpu.pipeline_mode<synchronous>, transform_indices = @transform_3, window_bounds = array<i64: 8, 48>}, {pipeline_mode = #tpu.pipeline_mode<synchronous>, transform_indices = @transform_4, window_bounds = array<i64: 1, 32>}, {pipeline_mode = #tpu.pipeline_mode<synchronous>, transform_indices = @transform_5, window_bounds = array<i64: 32, 112>}, {pipeline_mode = #tpu.pipeline_mode<synchronous>, transform_indices = @transform_6, window_bounds = array<i64: 32, 32>}, {pipeline_mode = #tpu.pipeline_mode<synchronous>, transform_indices = @transform_7, window_bounds = array<i64: 1, 32>}, {pipeline_mode = #tpu.pipeline_mode<synchronous>, transform_indices = @transform_8, window_bounds = array<i64: 32, 128>}, {pipeline_mode = #tpu.pipeline_mode<synchronous>, transform_indices = @transform_9, window_bounds = array<i64: 64, 32>}, {pipeline_mode = #tpu.pipeline_mode<synchronous>, transform_indices = @transform_10, window_bounds = array<i64: 8, 32>}, {pipeline_mode = #tpu.pipeline_mode<synchronous>, transform_indices = @transform_11, window_bounds = array<i64: 8, 16>}, {pipeline_mode = #tpu.pipeline_mode<synchronous>, transform_indices = @transform_12, window_bounds = array<i64: 8, 16>}]} {
    %c0 = arith.constant 0 : index
    %c0_0 = arith.constant 0 : index
    %0 = vector.load %arg1[%c0, %c0_0] : memref<8x32xf32, #tpu.memory_space<vmem>>, vector<8x32xf32>
    %c0_1 = arith.constant 0 : index
    %c0_2 = arith.constant 0 : index
    %1 = vector.load %arg5[%c0_1, %c0_2] : memref<1x32xf32, #tpu.memory_space<vmem>>, vector<1x32xf32>
    %2 = arith.mulf %0, %0 : vector<8x32xf32>
    %cst = arith.constant dense<0.000000e+00> : vector<8xf32>
    %3 = vector.multi_reduction <add>, %2, %cst [1] : vector<8x32xf32> to vector<8xf32>
    %4 = vector.shape_cast %3 : vector<8xf32> to vector<8x1xf32>
    %cst_3 = arith.constant 3.200000e+01 : f32
    %5 = vector.broadcast %cst_3 : f32 to vector<8x1xf32>
    %6 = arith.divf %4, %5 : vector<8x1xf32>
    %cst_4 = arith.constant 9.99999997E-7 : f32
    %7 = vector.broadcast %cst_4 : f32 to vector<8x1xf32>
    %8 = arith.addf %6, %7 : vector<8x1xf32>
    %9 = math.rsqrt %8 : vector<8x1xf32>
    %10 = vector.broadcast %9 : vector<8x1xf32> to vector<8x32xf32>
    %11 = arith.mulf %0, %10 : vector<8x32xf32>
    %12 = vector.broadcast %1 : vector<1x32xf32> to vector<8x32xf32>
    %13 = arith.mulf %11, %12 : vector<8x32xf32>
    %c0_5 = arith.constant 0 : index
    %c0_6 = arith.constant 0 : index
    %14 = vector.load %arg6[%c0_5, %c0_6] : memref<32x112xf32, #tpu.memory_space<vmem>>, vector<32x112xf32>
    %cst_7 = arith.constant dense<0.000000e+00> : vector<8x112xf32>
    %15 = tpu.matmul %13, %14, %cst_7 {dimension_numbers = #tpu.dot_dimension_numbers<[1], [0], [0], [1], [0, 0, 1, 1], [], []>} : vector<8x32xf32>, vector<32x112xf32>, vector<8x112xf32> -> vector<8x112xf32>
    %16 = vector.extract_strided_slice %15 {offsets = [0, 0], sizes = [8, 48], strides = [1, 1]} : vector<8x112xf32> to vector<8x48xf32>
    %17 = vector.extract_strided_slice %15 {offsets = [0, 48], sizes = [8, 16], strides = [1, 1]} : vector<8x112xf32> to vector<8x16xf32>
    %18 = vector.extract_strided_slice %15 {offsets = [0, 64], sizes = [8, 48], strides = [1, 1]} : vector<8x112xf32> to vector<8x48xf32>
    %c0_8 = arith.constant 0 : index
    %c0_9 = arith.constant 0 : index
    %19 = vector.load %arg3[%c0_8, %c0_9] : memref<8x48xf32, #tpu.memory_space<vmem>>, vector<8x48xf32>
    %20 = arith.mulf %16, %19 : vector<8x48xf32>
    %c0_10 = arith.constant 0 : index
    %c0_11 = arith.constant 0 : index
    %21 = vector.load %arg4[%c0_10, %c0_11] : memref<8x48xf32, #tpu.memory_space<vmem>>, vector<8x48xf32>
    %22 = arith.mulf %18, %21 : vector<8x48xf32>
    %23 = arith.addf %20, %22 : vector<8x48xf32>
    %24 = vector.extract_strided_slice %23 {offsets = [0, 0], sizes = [8, 32], strides = [1, 1]} : vector<8x48xf32> to vector<8x32xf32>
    %25 = vector.extract_strided_slice %23 {offsets = [0, 32], sizes = [8, 16], strides = [1, 1]} : vector<8x48xf32> to vector<8x16xf32>
    %c0_12 = arith.constant 0 : index
    %c0_13 = arith.constant 0 : index
    %26 = vector.load %arg12[%c0_12, %c0_13] : memref<8x16xf32, #tpu.memory_space<vmem>>, vector<8x16xf32>
    tpu.vector_store %arg12[%c0_12, %c0_13], %25 {strides = array<i32>} : memref<8x16xf32, #tpu.memory_space<vmem>>, vector<8x16xf32>,
    %c0_14 = arith.constant 0 : index
    %c0_15 = arith.constant 0 : index
    %27 = vector.load %arg13[%c0_14, %c0_15] : memref<8x16xf32, #tpu.memory_space<vmem>>, vector<8x16xf32>
    tpu.vector_store %arg13[%c0_14, %c0_15], %17 {strides = array<i32>} : memref<8x16xf32, #tpu.memory_space<vmem>>, vector<8x16xf32>,
    %28 = vector.extract_strided_slice %24 {offsets = [0, 0], sizes = [8, 8], strides = [1, 1]} : vector<8x32xf32> to vector<8x8xf32>
    %29 = vector.extract_strided_slice %24 {offsets = [0, 8], sizes = [8, 8], strides = [1, 1]} : vector<8x32xf32> to vector<8x8xf32>
    %30 = vector.extract_strided_slice %24 {offsets = [0, 16], sizes = [8, 8], strides = [1, 1]} : vector<8x32xf32> to vector<8x8xf32>
    %31 = vector.extract_strided_slice %24 {offsets = [0, 24], sizes = [8, 8], strides = [1, 1]} : vector<8x32xf32> to vector<8x8xf32>
    %32 = tpu.concatenate %28, %29, %30, %31 in 0 : vector<8x8xf32>, vector<8x8xf32>, vector<8x8xf32>, vector<8x8xf32> -> vector<32x8xf32>
    %33 = vector.extract_strided_slice %25 {offsets = [0, 0], sizes = [8, 8], strides = [1, 1]} : vector<8x16xf32> to vector<8x8xf32>
    %34 = vector.extract_strided_slice %25 {offsets = [0, 0], sizes = [8, 8], strides = [1, 1]} : vector<8x16xf32> to vector<8x8xf32>
    %35 = vector.extract_strided_slice %25 {offsets = [0, 8], sizes = [8, 8], strides = [1, 1]} : vector<8x16xf32> to vector<8x8xf32>
    %36 = vector.extract_strided_slice %25 {offsets = [0, 8], sizes = [8, 8], strides = [1, 1]} : vector<8x16xf32> to vector<8x8xf32>
    %37 = tpu.concatenate %33, %34, %35, %36 in 0 : vector<8x8xf32>, vector<8x8xf32>, vector<8x8xf32>, vector<8x8xf32> -> vector<32x8xf32>
    %38 = vector.extract_strided_slice %17 {offsets = [0, 0], sizes = [8, 8], strides = [1, 1]} : vector<8x16xf32> to vector<8x8xf32>
    %39 = vector.extract_strided_slice %17 {offsets = [0, 0], sizes = [8, 8], strides = [1, 1]} : vector<8x16xf32> to vector<8x8xf32>
    %40 = vector.extract_strided_slice %17 {offsets = [0, 8], sizes = [8, 8], strides = [1, 1]} : vector<8x16xf32> to vector<8x8xf32>
    %41 = vector.extract_strided_slice %17 {offsets = [0, 8], sizes = [8, 8], strides = [1, 1]} : vector<8x16xf32> to vector<8x8xf32>
    %42 = tpu.concatenate %38, %39, %40, %41 in 0 : vector<8x8xf32>, vector<8x8xf32>, vector<8x8xf32>, vector<8x8xf32> -> vector<32x8xf32>
    %cst_16 = arith.constant dense<0.000000e+00> : vector<32x32xf32>
    %43 = tpu.matmul %32, %37, %cst_16 {dimension_numbers = #tpu.dot_dimension_numbers<[1], [1], [0], [0], [0, 0, 1, 0], [], []>} : vector<32x8xf32>, vector<32x8xf32>, vector<32x32xf32> -> vector<32x32xf32>
    %cst_17 = arith.constant 0.353553385 : f32
    %44 = vector.broadcast %cst_17 : f32 to vector<32x32xf32>
    %45 = arith.mulf %43, %44 : vector<32x32xf32>
    %c0_18 = arith.constant 0 : index
    %c0_19 = arith.constant 0 : index
    %46 = vector.load %arg2[%c0_18, %c0_19] : memref<32x32xf32, #tpu.memory_space<vmem>>, vector<32x32xf32>
    %47 = arith.addf %45, %46 : vector<32x32xf32>
    %cst_20 = arith.constant dense<0xFF800000> : vector<32xf32>
    %48 = vector.multi_reduction <maximumf>, %47, %cst_20 [1] : vector<32x32xf32> to vector<32xf32>
    %49 = vector.shape_cast %48 : vector<32xf32> to vector<32x1xf32>
    %50 = vector.broadcast %49 : vector<32x1xf32> to vector<32x32xf32>
    %51 = arith.subf %47, %50 : vector<32x32xf32>
    %52 = math.exp %51 : vector<32x32xf32>
    %cst_21 = arith.constant dense<0.000000e+00> : vector<32xf32>
    %53 = vector.multi_reduction <add>, %52, %cst_21 [1] : vector<32x32xf32> to vector<32xf32>
    %54 = vector.shape_cast %53 : vector<32xf32> to vector<32x1xf32>
    %55 = tpu.reciprocal %54 {approx = true} : vector<32x1xf32> -> vector<32x1xf32>
    %56 = vector.broadcast %55 : vector<32x1xf32> to vector<32x32xf32>
    %57 = arith.mulf %52, %56 : vector<32x32xf32>
    %cst_22 = arith.constant dense<0.000000e+00> : vector<32x8xf32>
    %58 = tpu.matmul %57, %42, %cst_22 {dimension_numbers = #tpu.dot_dimension_numbers<[1], [0], [0], [1], [0, 0, 1, 1], [], []>} : vector<32x32xf32>, vector<32x8xf32>, vector<32x8xf32> -> vector<32x8xf32>
    %59 = vector.extract_strided_slice %58 {offsets = [0, 0], sizes = [8, 8], strides = [1, 1]} : vector<32x8xf32> to vector<8x8xf32>
    %60 = vector.extract_strided_slice %58 {offsets = [8, 0], sizes = [8, 8], strides = [1, 1]} : vector<32x8xf32> to vector<8x8xf32>
    %61 = vector.extract_strided_slice %58 {offsets = [16, 0], sizes = [8, 8], strides = [1, 1]} : vector<32x8xf32> to vector<8x8xf32>
    %62 = vector.extract_strided_slice %58 {offsets = [24, 0], sizes = [8, 8], strides = [1, 1]} : vector<32x8xf32> to vector<8x8xf32>
    %63 = tpu.concatenate %59, %60, %61, %62 in 1 : vector<8x8xf32>, vector<8x8xf32>, vector<8x8xf32>, vector<8x8xf32> -> vector<8x32xf32>
    %c0_23 = arith.constant 0 : index
    %c0_24 = arith.constant 0 : index
    %64 = vector.load %arg7[%c0_23, %c0_24] : memref<32x32xf32, #tpu.memory_space<vmem>>, vector<32x32xf32>
    %cst_25 = arith.constant dense<0.000000e+00> : vector<8x32xf32>
    %65 = tpu.matmul %63, %64, %cst_25 {dimension_numbers = #tpu.dot_dimension_numbers<[1], [0], [0], [1], [0, 0, 1, 1], [], []>} : vector<8x32xf32>, vector<32x32xf32>, vector<8x32xf32> -> vector<8x32xf32>
    %66 = arith.addf %0, %65 : vector<8x32xf32>
    %c0_26 = arith.constant 0 : index
    %c0_27 = arith.constant 0 : index
    %67 = vector.load %arg8[%c0_26, %c0_27] : memref<1x32xf32, #tpu.memory_space<vmem>>, vector<1x32xf32>
    %68 = arith.mulf %66, %66 : vector<8x32xf32>
    %cst_28 = arith.constant dense<0.000000e+00> : vector<8xf32>
    %69 = vector.multi_reduction <add>, %68, %cst_28 [1] : vector<8x32xf32> to vector<8xf32>
    %70 = vector.shape_cast %69 : vector<8xf32> to vector<8x1xf32>
    %cst_29 = arith.constant 3.200000e+01 : f32
    %71 = vector.broadcast %cst_29 : f32 to vector<8x1xf32>
    %72 = arith.divf %70, %71 : vector<8x1xf32>
    %cst_30 = arith.constant 9.99999997E-7 : f32
    %73 = vector.broadcast %cst_30 : f32 to vector<8x1xf32>
    %74 = arith.addf %72, %73 : vector<8x1xf32>
    %75 = math.rsqrt %74 : vector<8x1xf32>
    %76 = vector.broadcast %75 : vector<8x1xf32> to vector<8x32xf32>
    %77 = arith.mulf %66, %76 : vector<8x32xf32>
    %78 = vector.broadcast %67 : vector<1x32xf32> to vector<8x32xf32>
    %79 = arith.mulf %77, %78 : vector<8x32xf32>
    %c0_31 = arith.constant 0 : index
    %c0_32 = arith.constant 0 : index
    %80 = vector.load %arg9[%c0_31, %c0_32] : memref<32x128xf32, #tpu.memory_space<vmem>>, vector<32x128xf32>
    %cst_33 = arith.constant dense<0.000000e+00> : vector<8x128xf32>
    %81 = tpu.matmul %79, %80, %cst_33 {dimension_numbers = #tpu.dot_dimension_numbers<[1], [0], [0], [1], [0, 0, 1, 1], [], []>} : vector<8x32xf32>, vector<32x128xf32>, vector<8x128xf32> -> vector<8x128xf32>
    %82 = vector.extract_strided_slice %81 {offsets = [0, 0], sizes = [8, 64], strides = [1, 1]} : vector<8x128xf32> to vector<8x64xf32>
    %83 = vector.extract_strided_slice %81 {offsets = [0, 64], sizes = [8, 64], strides = [1, 1]} : vector<8x128xf32> to vector<8x64xf32>
    %84 = arith.negf %82 : vector<8x64xf32>
    %85 = math.exp %84 : vector<8x64xf32>
    %cst_34 = arith.constant 1.000000e+00 : f32
    %86 = vector.broadcast %cst_34 : f32 to vector<8x64xf32>
    %87 = arith.addf %86, %85 : vector<8x64xf32>
    %88 = arith.divf %86, %87 : vector<8x64xf32>
    %89 = arith.mulf %82, %88 : vector<8x64xf32>
    %90 = arith.mulf %89, %83 : vector<8x64xf32>
    %c0_35 = arith.constant 0 : index
    %c0_36 = arith.constant 0 : index
    %91 = vector.load %arg10[%c0_35, %c0_36] : memref<64x32xf32, #tpu.memory_space<vmem>>, vector<64x32xf32>
    %cst_37 = arith.constant dense<0.000000e+00> : vector<8x32xf32>
    %92 = tpu.matmul %90, %91, %cst_37 {dimension_numbers = #tpu.dot_dimension_numbers<[1], [0], [0], [1], [0, 0, 1, 1], [], []>} : vector<8x64xf32>, vector<64x32xf32>, vector<8x32xf32> -> vector<8x32xf32>
    %93 = arith.addf %66, %92 : vector<8x32xf32>
    %c0_38 = arith.constant 0 : index
    %c0_39 = arith.constant 0 : index
    %94 = vector.load %arg11[%c0_38, %c0_39] : memref<8x32xf32, #tpu.memory_space<vmem>>, vector<8x32xf32>
    tpu.vector_store %arg11[%c0_38, %c0_39], %93 {strides = array<i32>} : memref<8x32xf32, #tpu.memory_space<vmem>>, vector<8x32xf32>,
    return
  }
  func.func @transform_0(%arg0: i32) -> (i32, i32) {
    %c0_i32 = arith.constant 0 : i32
    %c0_i32_0 = arith.constant 0 : i32
    %c0_i32_1 = arith.constant 0 : i32
    return %c0_i32, %c0_i32_0 : i32, i32
  }
  func.func @transform_1(%arg0: i32) -> (i32, i32) {
    %c0_i32 = arith.constant 0 : i32
    %c0_i32_0 = arith.constant 0 : i32
    %c0_i32_1 = arith.constant 0 : i32
    return %c0_i32, %c0_i32_0 : i32, i32
  }
  func.func @transform_2(%arg0: i32) -> (i32, i32) {
    %c0_i32 = arith.constant 0 : i32
    %c0_i32_0 = arith.constant 0 : i32
    %c0_i32_1 = arith.constant 0 : i32
    return %c0_i32, %c0_i32_0 : i32, i32
  }
  func.func @transform_3(%arg0: i32) -> (i32, i32) {
    %c0_i32 = arith.constant 0 : i32
    %c0_i32_0 = arith.constant 0 : i32
    %c0_i32_1 = arith.constant 0 : i32
    return %c0_i32, %c0_i32_0 : i32, i32
  }
  func.func @transform_4(%arg0: i32) -> (i32, i32) {
    %c0_i32 = arith.constant 0 : i32
    %c0_i32_0 = arith.constant 0 : i32
    %c0_i32_1 = arith.constant 0 : i32
    return %c0_i32, %c0_i32_0 : i32, i32
  }
  func.func @transform_5(%arg0: i32) -> (i32, i32) {
    %c0_i32 = arith.constant 0 : i32
    %c0_i32_0 = arith.constant 0 : i32
    %c0_i32_1 = arith.constant 0 : i32
    return %c0_i32, %c0_i32_0 : i32, i32
  }
  func.func @transform_6(%arg0: i32) -> (i32, i32) {
    %c0_i32 = arith.constant 0 : i32
    %c0_i32_0 = arith.constant 0 : i32
    %c0_i32_1 = arith.constant 0 : i32
    return %c0_i32, %c0_i32_0 : i32, i32
  }
  func.func @transform_7(%arg0: i32) -> (i32, i32) {
    %c0_i32 = arith.constant 0 : i32
    %c0_i32_0 = arith.constant 0 : i32
    %c0_i32_1 = arith.constant 0 : i32
    return %c0_i32, %c0_i32_0 : i32, i32
  }
  func.func @transform_8(%arg0: i32) -> (i32, i32) {
    %c0_i32 = arith.constant 0 : i32
    %c0_i32_0 = arith.constant 0 : i32
    %c0_i32_1 = arith.constant 0 : i32
    return %c0_i32, %c0_i32_0 : i32, i32
  }
  func.func @transform_9(%arg0: i32) -> (i32, i32) {
    %c0_i32 = arith.constant 0 : i32
    %c0_i32_0 = arith.constant 0 : i32
    %c0_i32_1 = arith.constant 0 : i32
    return %c0_i32, %c0_i32_0 : i32, i32
  }
  func.func @transform_10(%arg0: i32) -> (i32, i32) {
    %c0_i32 = arith.constant 0 : i32
    %c0_i32_0 = arith.constant 0 : i32
    %c0_i32_1 = arith.constant 0 : i32
    return %c0_i32, %c0_i32_0 : i32, i32
  }
  func.func @transform_11(%arg0: i32) -> (i32, i32) {
    %c0_i32 = arith.constant 0 : i32
    %c0_i32_0 = arith.constant 0 : i32
    %c0_i32_1 = arith.constant 0 : i32
    return %c0_i32, %c0_i32_0 : i32, i32
  }
  func.func @transform_12(%arg0: i32) -> (i32, i32) {
    %c0_i32 = arith.constant 0 : i32
    %c0_i32_0 = arith.constant 0 : i32
    %c0_i32_1 = arith.constant 0 : i32
    return %c0_i32, %c0_i32_0 : i32, i32
  }
}

</mosaic_0001>

<bundles_post_ra>
// kernel: tile.46
= control target key start
LH: loop header
LB: loop body
LE: loop exit
PB: predicated region body
PF: predicated region fallthrough
CT: control target
= control target key end

     0   :  { %s250_s0 = inlined_call_operand.vmem [shape: f32[8,8], index: 0, kind: input, shape index: {}]   ;;  %s251_s1 = inlined_call_operand.vmem [shape: f32[4,8,4,8], index: 1, kind: output, shape index: {}]  }
   0x1   :  { %v4_v0 = vld [vmem:[%s250_s0] ss:$0 sm:$0xff]  ;;  %v85_v1 = vld [vmem:[%s250_s0 + $0x1] ss:$0 sm:$0xff]  ;;  %v90_v2 = vld [vmem:[%s250_s0 + $0x2] ss:$0 sm:$0xff] }
   0x2   :  { %5 = vst [vmem:[%s251_s1] sm:$0xf] %v4_v0  ;;  %v95_v3 = vld [vmem:[%s250_s0 + $0x3] ss:$0 sm:$0xff]  ;;  %v100_v4 = vld [vmem:[%s250_s0 + $0x4] ss:$0 sm:$0xff] }
   0x3   :  { %82 = vst [vmem:[%s251_s1 + $0x20] sm:$0xf] %v4_v0  ;;  %v105_v5 = vld [vmem:[%s250_s0 + $0x5] ss:$0 sm:$0xff]  ;;  %v110_v6 = vld [vmem:[%s250_s0 + $0x6] ss:$0 sm:$0xff] }
   0x4   :  { %83 = vst [vmem:[%s251_s1 + $0x40] sm:$0xf] %v4_v0  ;;  %v115_v7 = vld [vmem:[%s250_s0 + $0x7] ss:$0 sm:$0xff] }
   0x5   :  { %84 = vst [vmem:[%s251_s1 + $0x60] sm:$0xf] %v4_v0 }
   0x6   :  { %86 = vst [vmem:[%s251_s1 + $0x4] sm:$0xf] %v85_v1 }
   0x7   :  { %87 = vst [vmem:[%s251_s1 + $0x24] sm:$0xf] %v85_v1 }
   0x8   :  { %88 = vst [vmem:[%s251_s1 + $0x44] sm:$0xf] %v85_v1 }
   0x9   :  { %89 = vst [vmem:[%s251_s1 + $0x64] sm:$0xf] %v85_v1 }
   0xa   :  { %91 = vst [vmem:[%s251_s1 + $0x8] sm:$0xf] %v90_v2 }
   0xb   :  { %92 = vst [vmem:[%s251_s1 + $0x28] sm:$0xf] %v90_v2 }
   0xc   :  { %93 = vst [vmem:[%s251_s1 + $0x48] sm:$0xf] %v90_v2 }
   0xd   :  { %94 = vst [vmem:[%s251_s1 + $0x68] sm:$0xf] %v90_v2 }
   0xe   :  { %96 = vst [vmem:[%s251_s1 + $0xc] sm:$0xf] %v95_v3 }
   0xf   :  { %97 = vst [vmem:[%s251_s1 + $0x2c] sm:$0xf] %v95_v3 }
  0x10   :  { %98 = vst [vmem:[%s251_s1 + $0x4c] sm:$0xf] %v95_v3 }
  0x11   :  { %99 = vst [vmem:[%s251_s1 + $0x6c] sm:$0xf] %v95_v3 }
  0x12   :  { %101 = vst [vmem:[%s251_s1 + $0x10] sm:$0xf] %v100_v4 }
  0x13   :  { %102 = vst [vmem:[%s251_s1 + $0x30] sm:$0xf] %v100_v4 }
  0x14   :  { %103 = vst [vmem:[%s251_s1 + $0x50] sm:$0xf] %v100_v4 }
  0x15   :  { %104 = vst [vmem:[%s251_s1 + $0x70] sm:$0xf] %v100_v4 }
  0x16   :  { %106 = vst [vmem:[%s251_s1 + $0x14] sm:$0xf] %v105_v5 }
  0x17   :  { %107 = vst [vmem:[%s251_s1 + $0x34] sm:$0xf] %v105_v5 }
  0x18   :  { %108 = vst [vmem:[%s251_s1 + $0x54] sm:$0xf] %v105_v5 }
  0x19   :  { %109 = vst [vmem:[%s251_s1 + $0x74] sm:$0xf] %v105_v5 }
  0x1a   :  { %111 = vst [vmem:[%s251_s1 + $0x18] sm:$0xf] %v110_v6 }
  0x1b   :  { %112 = vst [vmem:[%s251_s1 + $0x38] sm:$0xf] %v110_v6 }
  0x1c   :  { %113 = vst [vmem:[%s251_s1 + $0x58] sm:$0xf] %v110_v6 }
  0x1d   :  { %114 = vst [vmem:[%s251_s1 + $0x78] sm:$0xf] %v110_v6 }
  0x1e   :  { %116 = vst [vmem:[%s251_s1 + $0x1c] sm:$0xf] %v115_v7 }
  0x1f   :  { %117 = vst [vmem:[%s251_s1 + $0x3c] sm:$0xf] %v115_v7 }
  0x20   :  { %118 = vst [vmem:[%s251_s1 + $0x5c] sm:$0xf] %v115_v7 }
  0x21   :  { %119 = vst [vmem:[%s251_s1 + $0x7c] sm:$0xf] %v115_v7 }

// kernel: tile.47
= control target key start
LH: loop header
LB: loop body
LE: loop exit
PB: predicated region body
PF: predicated region fallthrough
CT: control target
= control target key end

     0   :  { %vm132_vm0 = vcmask 1047556   ;;  %s338_s15 = smov 24   ;;  %s339_s30 = smov 16   ;;  %vm134_vm1 = vcmask 64512   ;;  %vm171_vm2 = vcmask 261312   ;;  %vm214_vm3 = vcmask 195712   ;;  %s535_s0 = inlined_call_operand.vmem [shape: f32[4,8,4,8], index: 0, kind: input, shape index: {}]   ;;  %s536_s1 = inlined_call_operand.vmem [shape: f32[32,32], index: 1, kind: output, shape index: {}]  }
   0x1   :  { %v316_v0 = vld [vmem:[%s535_s0 + $0x1c] sm:$0xf]  ;;  %v317_v1 = vld [vmem:[%s535_s0 + $0x18] sm:$0xf]  ;;  %v318_v2 = vld [vmem:[%s535_s0 + $0x14] sm:$0xf] }
   0x2   :  { %103 = vst [vmem:[#allocation0 + $0x38] sm:$0xf] %v316_v0  ;;  %v319_v3 = vld [vmem:[%s535_s0 + $0x10] sm:$0xf]  ;;  %v320_v4 = vld [vmem:[%s535_s0 + $0xc] sm:$0xf] }
   0x3   :  { %107 = vst [vmem:[#allocation0 + $0x30] sm:$0xf] %v317_v1  ;;  %v321_v5 = vld [vmem:[%s535_s0 + $0x8] sm:$0xf]  ;;  %v322_v6 = vld [vmem:[%s535_s0 + $0x4] sm:$0xf] }
   0x4   :  { %111 = vst [vmem:[#allocation0 + $0x28] sm:$0xf] %v318_v2  ;;  %v128_v7 = vld [vmem:[%s535_s0] sm:$0xf]  ;;  %v300_v8 = vld [vmem:[%s535_s0 + $0x5c] sm:$0xf] }
   0x5   :  { %115 = vst [vmem:[#allocation0 + $0x20] sm:$0xf] %v319_v3  ;;  %v301_v9 = vld [vmem:[%s535_s0 + $0x58] sm:$0xf]  ;;  %v302_v10 = vld [vmem:[%s535_s0 + $0x54] sm:$0xf] }
   0x6   :  { %119 = vst [vmem:[#allocation0 + $0x18] sm:$0xf] %v320_v4  ;;  %v303_v11 = vld [vmem:[%s535_s0 + $0x50] sm:$0xf]  ;;  %v304_v12 = vld [vmem:[%s535_s0 + $0x4c] sm:$0xf] }
   0x7   :  { %123 = vst [vmem:[#allocation0 + $0x10] sm:$0xf] %v321_v5  ;;  %v305_v13 = vld [vmem:[%s535_s0 + $0x48] sm:$0xf]  ;;  %v306_v14 = vld [vmem:[%s535_s0 + $0x44] sm:$0xf] }
   0x8   :  { %127 = vst [vmem:[#allocation0 + $0x8] sm:$0xf] %v322_v6  ;;  %v307_v15 = vld [vmem:[%s535_s0 + $0x40] sm:$0xf]  ;;  %v308_v17 = vld [vmem:[%s535_s0 + $0x3c] sm:$0xf] }
   0x9   :  { %129 = vst [vmem:[#allocation0] sm:$0xf] %v128_v7  ;;  %v309_v18 = vld [vmem:[%s535_s0 + $0x38] sm:$0xf]  ;;  %v310_v21 = vld [vmem:[%s535_s0 + $0x34] sm:$0xf] }
   0xa   :  { %39 = vst [vmem:[#allocation0 + $0xb8] sm:$0xf] %v300_v8  ;;  %v311_v22 = vld [vmem:[%s535_s0 + $0x30] sm:$0xf]  ;;  %v312_v23 = vld [vmem:[%s535_s0 + $0x2c] sm:$0xf] }
   0xb   :  { %43 = vst [vmem:[#allocation0 + $0xb0] sm:$0xf] %v301_v9  ;;  %v313_v24 = vld [vmem:[%s535_s0 + $0x28] sm:$0xf]  ;;  %v314_v25 = vld [vmem:[%s535_s0 + $0x24] sm:$0xf] }
   0xc   :  { %47 = vst [vmem:[#allocation0 + $0xa8] sm:$0xf] %v302_v10  ;;  %v166_v16 = vld [vmem:[#allocation0 + $0x3] ss:$8 sm:$0xf0]   ;;  %vm257_vm4 = vcmask 130112  }
   0xd   :  { %51 = vst [vmem:[#allocation0 + $0xa0] sm:$0xf] %v303_v11  ;;  %v315_v26 = vld [vmem:[%s535_s0 + $0x20] sm:$0xf]  ;;  %v292_v30 = vld [vmem:[%s535_s0 + $0x7c] sm:$0xf] }
   0xe   :  { %55 = vst [vmem:[#allocation0 + $0x98] sm:$0xf] %v304_v12  ;;  %v209_v29 = vld [vmem:[#allocation0 + $0x2] ss:$8 sm:$0xf0]  }
   0xf   :  { %59 = vst [vmem:[#allocation0 + $0x90] sm:$0xf] %v305_v13  ;;  %v293_v31 = vld [vmem:[%s535_s0 + $0x78] sm:$0xf]  ;;  %v294_v35 = vld [vmem:[%s535_s0 + $0x74] sm:$0xf] }
  0x10   :  { %v164_v19 = vld [vmem:[#allocation0 + $0x3] ss:$8 sm:$0xf]   ;;  %63 = vst [vmem:[#allocation0 + $0x88] sm:$0xf] %v306_v14 }
  0x11   :  { %v168_v20 = vsel %vm132_vm0, %v166_v16, %v164_v19  ;;  %67 = vst [vmem:[#allocation0 + $0x80] sm:$0xf] %v307_v15  ;;  %v207_v27 = vld [vmem:[#allocation0 + $0x2] ss:$8 sm:$0xf]  }
  0x12   :  { %169 = vrot.lane.b32.xlu0 %v168_v20, %s338_s15  ;;  %71 = vst [vmem:[#allocation0 + $0x78] sm:$0xf] %v308_v17  ;;  %v211_v32 = vsel %vm132_vm0, %v209_v29, %v207_v27  ;;  %v295_v36 = vld [vmem:[%s535_s0 + $0x70] sm:$0xf]  ;;  %v296_v37 = vld [vmem:[%s535_s0 + $0x6c] sm:$0xf] }
  0x13   :  { %75 = vst [vmem:[#allocation0 + $0x70] sm:$0xf] %v309_v18  ;;  %212 = vrot.lane.b32.xlu2 %v211_v32, %s339_s30  ;;  %v297_v38 = vld [vmem:[%s535_s0 + $0x68] sm:$0xf]  ;;  %v298_v39 = vld [vmem:[%s535_s0 + $0x64] sm:$0xf] }
  0x14   :  { %79 = vst [vmem:[#allocation0 + $0x68] sm:$0xf] %v310_v21  ;;  %v187_v28 = vld [vmem:[#allocation0 + $0x83] ss:$8 sm:$0xf0]  }
  0x15   :  { %83 = vst [vmem:[#allocation0 + $0x60] sm:$0xf] %v311_v22  ;;  %v299_v40 = vld [vmem:[%s535_s0 + $0x60] sm:$0xf]  ;;  %s340_s0 = smov 8  }
  0x16   :  { %87 = vst [vmem:[#allocation0 + $0x58] sm:$0xf] %v312_v23  ;;  %v230_v48 = vld [vmem:[#allocation0 + $0x82] ss:$8 sm:$0xf0]  }
  0x17   :  { %91 = vst [vmem:[#allocation0 + $0x50] sm:$0xf] %v313_v24  ;;  %v250_v49 = vld [vmem:[#allocation0 + $0x1] ss:$8 sm:$0xf]  }
  0x18   :  { %v185_v33 = vld [vmem:[#allocation0 + $0x83] ss:$8 sm:$0xf]   ;;  %95 = vst [vmem:[#allocation0 + $0x48] sm:$0xf] %v314_v25 }
  0x19   :  { %v189_v34 = vsel %vm132_vm0, %v187_v28, %v185_v33  ;;  %99 = vst [vmem:[#allocation0 + $0x40] sm:$0xf] %v315_v26  ;;  %v228_v47 = vld [vmem:[#allocation0 + $0x82] ss:$8 sm:$0xf]  }
  0x1a   :  { %190 = vrot.lane.b32.xlu1 %v189_v34, %s338_s15  ;;  %7 = vst [vmem:[#allocation0 + $0xf8] sm:$0xf] %v292_v30  ;;  %v252_v51 = vld [vmem:[#allocation0 + $0x1] ss:$8 sm:$0xf0]   ;;  %v232_v52 = vsel %vm132_vm0, %v230_v48, %v228_v47 }
  0x1b   :  { %11 = vst [vmem:[#allocation0 + $0xf0] sm:$0xf] %v293_v31  ;;  %v254_v55 = vsel %vm132_vm0, %v252_v51, %v250_v49  ;;  %v271_v1 = vld [vmem:[#allocation0 + $0x81] ss:$8 sm:$0xf]  }
  0x1c   :  { %15 = vst [vmem:[#allocation0 + $0xe8] sm:$0xf] %v294_v35  ;;  %v176_v41 = vld [vmem:[#allocation0 + $0x43] ss:$8 sm:$0xf0]  }
  0x1d   :  { %19 = vst [vmem:[#allocation0 + $0xe0] sm:$0xf] %v295_v36  ;;  %v219_v42 = vld [vmem:[#allocation0 + $0x42] ss:$8 sm:$0xf0]  }
  0x1e   :  { %23 = vst [vmem:[#allocation0 + $0xd8] sm:$0xf] %v296_v37  ;;  %v262_v57 = vld [vmem:[#allocation0 + $0x41] ss:$8 sm:$0xf0]  }
  0x1f   :  { %27 = vst [vmem:[#allocation0 + $0xd0] sm:$0xf] %v297_v38  ;;  %v273_v2 = vld [vmem:[#allocation0 + $0x81] ss:$8 sm:$0xf0]  }
  0x20   :  { %v174_v43 = vld [vmem:[#allocation0 + $0x43] ss:$8 sm:$0xf]   ;;  %31 = vst [vmem:[#allocation0 + $0xc8] sm:$0xf] %v298_v39  ;;  %v275_v3 = vsel %vm132_vm0, %v273_v2, %v271_v1 }
  0x21   :  { %v178_v44 = vsel %vm132_vm0, %v176_v41, %v174_v43  ;;  %35 = vst [vmem:[#allocation0 + $0xc0] sm:$0xf] %v299_v40  ;;  %v217_v45 = vld [vmem:[#allocation0 + $0x42] ss:$8 sm:$0xf]  }
  0x22   :  { %179 = vrot.lane.b32.xlu0 %v178_v44, %s338_s15  ;;  %v221_v46 = vsel %vm132_vm0, %v219_v42, %v217_v45  ;;  %v260_v56 = vld [vmem:[#allocation0 + $0x41] ss:$8 sm:$0xf]   ;;  %v130_v4 = vld [vmem:[#allocation0] ss:$8 sm:$0xf]  }
  0x23   :  { %222 = vrot.lane.b32.xlu2 %v221_v46, %s339_s30  ;;  %v264_v63 = vsel %vm132_vm0, %v262_v57, %v260_v56  ;;  %v131_v5 = vld [vmem:[#allocation0] ss:$8 sm:$0xf0]  }
  0x24   :  { %v198_v50 = vld [vmem:[#allocation0 + $0xc3] ss:$8 sm:$0xf0]   ;;  %v241_v59 = vld [vmem:[#allocation0 + $0xc2] ss:$8 sm:$0xf0]   ;;  %v133_v6 = vsel %vm132_vm0, %v131_v5, %v130_v4 }
  0x25   :  { %v284_v61 = vld [vmem:[#allocation0 + $0xc1] ss:$8 sm:$0xf0]   ;;  %135 = vst.msk [vmem:[%s536_s1] sm:$0xff] %vm134_vm1, %v133_v6  }
  0x26   :  { %v146_v7 = vld [vmem:[#allocation0 + $0x80] ss:$8 sm:$0xf]  }
  0x27   :  { %v148_v8 = vld [vmem:[#allocation0 + $0x80] ss:$8 sm:$0xf0]  }
  0x28   :  { %v196_v53 = vld [vmem:[#allocation0 + $0xc3] ss:$8 sm:$0xf]   ;;  %v239_v58 = vld [vmem:[#allocation0 + $0xc2] ss:$8 sm:$0xf]   ;;  %v150_v9 = vsel %vm132_vm0, %v148_v8, %v146_v7 }
  0x29   :  { %v200_v54 = vsel %vm132_vm0, %v198_v50, %v196_v53  ;;  %v282_v60 = vld [vmem:[#allocation0 + $0xc1] ss:$8 sm:$0xf]   ;;  %v243_v62 = vsel %vm132_vm0, %v241_v59, %v239_v58  ;;  %324 = vst.msk [vmem:[%s536_s1 + $0x10] sm:$0xff] %vm134_vm1, %v150_v9  }
  0x2a   :  { %201 = vrot.lane.b32.xlu1 %v200_v54, %s338_s15  ;;  %233 = vrot.lane.b32.xlu0 %v232_v52, %s339_s30  ;;  %v286_v0 = vsel %vm132_vm0, %v284_v61, %v282_v60  ;;  %v137_v11 = vld [vmem:[#allocation0 + $0x40] ss:$8 sm:$0xf]  }
  0x2b   :  { %255 = vrot.lane.b32.xlu2 %v254_v55, %s340_s0  ;;  %v139_v12 = vld [vmem:[#allocation0 + $0x40] ss:$8 sm:$0xf0]  }
  0x2c   :  { %v141_v13 = vsel %vm132_vm0, %v139_v12, %v137_v11  ;;  %v155_v14 = vld [vmem:[#allocation0 + $0xc0] ss:$8 sm:$0xf]  }
  0x2d   :  { %323 = vst.msk [vmem:[%s536_s1 + $0x8] sm:$0xff] %vm134_vm1, %v141_v13   ;;  %v157_v15 = vld [vmem:[#allocation0 + $0xc0] ss:$8 sm:$0xf0]  }
  0x2e   :  { %v159_v16 = vsel %vm132_vm0, %v157_v15, %v155_v14 }
  0x2f   :  { %325 = vst.msk [vmem:[%s536_s1 + $0x18] sm:$0xff] %vm134_vm1, %v159_v16  }
  0x32   :  { %244 = vrot.lane.b32.xlu1 %v243_v62, %s339_s30  ;;  %265 = vrot.lane.b32.xlu0 %v264_v63, %s340_s0 }
  0x33   :  { %287 = vrot.lane.b32.xlu2 %v286_v0, %s340_s0 }
  0x3a   :  { %276 = vrot.lane.b32.xlu1 %v275_v3, %s340_s0 }
  0x6d   :  { %v213_v10 = vpop.permute.xlu2 %212  }
  0x7d   :  { %v223_v17 = vpop.permute.xlu2 %222  }
  0x84   :  { %v170_v18 = vpop.permute.xlu0 %169  }
  0x85   :  { %172 = vst.msk [vmem:[%s536_s1] sm:$0xff] %vm171_vm2, %v170_v18   ;;  %v256_v19 = vpop.permute.xlu2 %255  }
  0x86   :  { %215 = vst.msk [vmem:[%s536_s1] sm:$0xff] %vm214_vm3, %v213_v10  }
  0x87   :  { %258 = vst.msk [vmem:[%s536_s1] sm:$0xff] %vm257_vm4, %v256_v19  }
  0x8c   :  { %v191_v20 = vpop.permute.xlu1 %190  }
  0x8d   :  { %327 = vst.msk [vmem:[%s536_s1 + $0x10] sm:$0xff] %vm171_vm2, %v191_v20   ;;  %v288_v21 = vpop.permute.xlu2 %287  }
  0x94   :  { %v180_v22 = vpop.permute.xlu0 %179  }
  0x95   :  { %326 = vst.msk [vmem:[%s536_s1 + $0x8] sm:$0xff] %vm171_vm2, %v180_v22  }
  0x96   :  { %329 = vst.msk [vmem:[%s536_s1 + $0x8] sm:$0xff] %vm214_vm3, %v223_v17  }
  0x9c   :  { %v202_v23 = vpop.permute.xlu1 %201   ;;  %v234_v24 = vpop.permute.xlu0 %233  }
  0x9d   :  { %328 = vst.msk [vmem:[%s536_s1 + $0x18] sm:$0xff] %vm171_vm2, %v202_v23  }
  0x9e   :  { %330 = vst.msk [vmem:[%s536_s1 + $0x10] sm:$0xff] %vm214_vm3, %v234_v24  }
  0xa4   :  { %v245_v25 = vpop.permute.xlu1 %244   ;;  %v266_v26 = vpop.permute.xlu0 %265  }
  0xa5   :  { %331 = vst.msk [vmem:[%s536_s1 + $0x18] sm:$0xff] %vm214_vm3, %v245_v25  }
  0xa6   :  { %332 = vst.msk [vmem:[%s536_s1 + $0x8] sm:$0xff] %vm257_vm4, %v266_v26  }
  0xa7   :  { %334 = vst.msk [vmem:[%s536_s1 + $0x18] sm:$0xff] %vm257_vm4, %v288_v21  }
  0xac   :  { %v277_v27 = vpop.permute.xlu1 %276  }
  0xad   :  { %333 = vst.msk [vmem:[%s536_s1 + $0x10] sm:$0xff] %vm257_vm4, %v277_v27  }

// kernel: tile.28
= control target key start
LH: loop header
LB: loop body
LE: loop exit
PB: predicated region body
PF: predicated region fallthrough
CT: control target
= control target key end

     0   :  { %vm36_vm0 = vcmask 1047556   ;;  %s81_s22 = smov 8   ;;  %s82_s23 = smov 16   ;;  %vm38_vm1 = vcmask 64512   ;;  %vm48_vm2 = vcmask 261312   ;;  %vm58_vm3 = vcmask 195712   ;;  %s133_s0 = inlined_call_operand.vmem [shape: f32[8,4,8], index: 0, kind: input, shape index: {}]   ;;  %s134_s1 = inlined_call_operand.vmem [shape: f32[8,32], index: 1, kind: output, shape index: {}]  }
   0x1   :  { %v70_v0 = vld [vmem:[%s133_s0 + $0x1c] sm:$0xf]  ;;  %v71_v1 = vld [vmem:[%s133_s0 + $0x18] sm:$0xf]  ;;  %v72_v2 = vld [vmem:[%s133_s0 + $0x14] sm:$0xf] }
   0x2   :  { %7 = vst [vmem:[#allocation0 + $0x38] sm:$0xf] %v70_v0  ;;  %v73_v3 = vld [vmem:[%s133_s0 + $0x10] sm:$0xf]  ;;  %v74_v4 = vld [vmem:[%s133_s0 + $0xc] sm:$0xf] }
   0x3   :  { %11 = vst [vmem:[#allocation0 + $0x30] sm:$0xf] %v71_v1  ;;  %v75_v5 = vld [vmem:[%s133_s0 + $0x8] sm:$0xf]  ;;  %v76_v6 = vld [vmem:[%s133_s0 + $0x4] sm:$0xf] }
   0x4   :  { %15 = vst [vmem:[#allocation0 + $0x28] sm:$0xf] %v72_v2  ;;  %v32_v7 = vld [vmem:[%s133_s0] sm:$0xf]  ;;  %s80_s0 = smov 24   ;;  %vm68_vm4 = vcmask 130112  }
   0x5   :  { %19 = vst [vmem:[#allocation0 + $0x20] sm:$0xf] %v73_v3 }
   0x6   :  { %23 = vst [vmem:[#allocation0 + $0x18] sm:$0xf] %v74_v4 }
   0x7   :  { %27 = vst [vmem:[#allocation0 + $0x10] sm:$0xf] %v75_v5 }
   0x8   :  { %31 = vst [vmem:[#allocation0 + $0x8] sm:$0xf] %v76_v6 }
   0x9   :  { %33 = vst [vmem:[#allocation0] sm:$0xf] %v32_v7 }
   0xc   :  { %v43_v8 = vld [vmem:[#allocation0 + $0x3] ss:$8 sm:$0xf0]   ;;  %v63_v9 = vld [vmem:[#allocation0 + $0x1] ss:$8 sm:$0xf0]  }
   0xd   :  { %v53_v15 = vld [vmem:[#allocation0 + $0x2] ss:$8 sm:$0xf0]   ;;  %v35_v18 = vld [vmem:[#allocation0] ss:$8 sm:$0xf0]  }
  0x10   :  { %v41_v10 = vld [vmem:[#allocation0 + $0x3] ss:$8 sm:$0xf]   ;;  %v61_v12 = vld [vmem:[#allocation0 + $0x1] ss:$8 sm:$0xf]  }
  0x11   :  { %v45_v11 = vsel %vm36_vm0, %v43_v8, %v41_v10  ;;  %v65_v13 = vsel %vm36_vm0, %v63_v9, %v61_v12  ;;  %v51_v14 = vld [vmem:[#allocation0 + $0x2] ss:$8 sm:$0xf]   ;;  %v34_v17 = vld [vmem:[#allocation0] ss:$8 sm:$0xf]  }
  0x12   :  { %46 = vrot.lane.b32.xlu0 %v45_v11, %s80_s0  ;;  %66 = vrot.lane.b32.xlu1 %v65_v13, %s81_s22  ;;  %v55_v16 = vsel %vm36_vm0, %v53_v15, %v51_v14  ;;  %v37_v19 = vsel %vm36_vm0, %v35_v18, %v34_v17 }
  0x13   :  { %39 = vst.msk [vmem:[%s134_s1] sm:$0xff] %vm38_vm1, %v37_v19  }
  0x1a   :  { %56 = vrot.lane.b32.xlu0 %v55_v16, %s82_s23 }
  0x84   :  { %v47_v20 = vpop.permute.xlu0 %46   ;;  %v67_v21 = vpop.permute.xlu1 %66  }
  0x85   :  { %49 = vst.msk [vmem:[%s134_s1] sm:$0xff] %vm48_vm2, %v47_v20  }
  0x8c   :  { %v57_v22 = vpop.permute.xlu0 %56  }
  0x8d   :  { %59 = vst.msk [vmem:[%s134_s1] sm:$0xff] %vm58_vm3, %v57_v22  }
  0x8e   :  { %69 = vst.msk [vmem:[%s134_s1] sm:$0xff] %vm68_vm4, %v67_v21  }

// kernel: tile.33
= control target key start
LH: loop header
LB: loop body
LE: loop exit
PB: predicated region body
PF: predicated region fallthrough
CT: control target
= control target key end

     0   :  { %vm36_vm0 = vcmask 1047556   ;;  %vm38_vm1 = vcmask 64512   ;;  %vm48_vm2 = vcmask 130112   ;;  %s99_s0 = inlined_call_operand.vmem [shape: f32[8,2,8], index: 0, kind: input, shape index: {}]   ;;  %s100_s1 = inlined_call_operand.vmem [shape: f32[8,16], index: 1, kind: output, shape index: {}]  }
   0x1   :  { %v50_v0 = vld [vmem:[%s99_s0 + $0xe] sm:$0x3]  ;;  %v51_v1 = vld [vmem:[%s99_s0 + $0xc] sm:$0x3]  ;;  %v52_v2 = vld [vmem:[%s99_s0 + $0xa] sm:$0x3] }
   0x2   :  { %7 = vst [vmem:[#allocation0 + $0x38] sm:$0x3] %v50_v0  ;;  %v53_v3 = vld [vmem:[%s99_s0 + $0x8] sm:$0x3]  ;;  %v54_v4 = vld [vmem:[%s99_s0 + $0x6] sm:$0x3] }
   0x3   :  { %11 = vst [vmem:[#allocation0 + $0x30] sm:$0x3] %v51_v1  ;;  %v55_v5 = vld [vmem:[%s99_s0 + $0x4] sm:$0x3]  ;;  %v56_v6 = vld [vmem:[%s99_s0 + $0x2] sm:$0x3] }
   0x4   :  { %15 = vst [vmem:[#allocation0 + $0x28] sm:$0x3] %v52_v2  ;;  %v32_v7 = vld [vmem:[%s99_s0] sm:$0x3]  ;;  %s58_s0 = smov 8  }
   0x5   :  { %19 = vst [vmem:[#allocation0 + $0x20] sm:$0x3] %v53_v3 }
   0x6   :  { %23 = vst [vmem:[#allocation0 + $0x18] sm:$0x3] %v54_v4 }
   0x7   :  { %27 = vst [vmem:[#allocation0 + $0x10] sm:$0x3] %v55_v5 }
   0x8   :  { %31 = vst [vmem:[#allocation0 + $0x8] sm:$0x3] %v56_v6 }
   0x9   :  { %33 = vst [vmem:[#allocation0] sm:$0x3] %v32_v7 }
   0xc   :  { %v35_v8 = vld [vmem:[#allocation0] ss:$8 sm:$0xf0]   ;;  %v43_v9 = vld [vmem:[#allocation0 + $0x1] ss:$8 sm:$0xf0]  }
  0x10   :  { %v34_v10 = vld [vmem:[#allocation0] ss:$8 sm:$0xf]   ;;  %v41_v11 = vld [vmem:[#allocation0 + $0x1] ss:$8 sm:$0xf]  }
  0x11   :  { %v37_v12 = vsel %vm36_vm0, %v35_v8, %v34_v10  ;;  %v45_v13 = vsel %vm36_vm0, %v43_v9, %v41_v11 }
  0x12   :  { %46 = vrot.lane.b32.xlu0 %v45_v13, %s58_s0  ;;  %39 = vst.msk [vmem:[%s100_s1] sm:$0xff] %vm38_vm1, %v37_v12  }
  0x84   :  { %v47_v14 = vpop.permute.xlu0 %46  }
  0x85   :  { %49 = vst.msk [vmem:[%s100_s1] sm:$0xff] %vm48_vm2, %v47_v14  }

// kernel: block_forward.1
= control target key start
LH: loop header
LB: loop body
LE: loop exit
PB: predicated region body
PF: predicated region fallthrough
CT: control target
= control target key end

     0   :  { %vm42_vm0 = vcmask 261120   ;;  %s768_s0 = inlined_call_operand.vmem [shape: f32[8,32], index: 0, kind: input, shape index: {}]   ;;  %s769_s1 = inlined_call_operand.vmem [shape: f32[32,32], index: 1, kind: input, shape index: {}]   ;;  %s770_s2 = inlined_call_operand.vmem [shape: f32[8,48], index: 2, kind: input, shape index: {}]   ;;  %s771_s3 = inlined_call_operand.vmem [shape: f32[8,48], index: 3, kind: input, shape index: {}]   ;;  %s772_s4 = inlined_call_operand.vmem [shape: f32[1,32], index: 4, kind: input, shape index: {}]   ;;  %s773_s5 = inlined_call_operand.vmem [shape: f32[32,112], index: 5, kind: input, shape index: {}]   ;;  %s774_s6 = inlined_call_operand.vmem [shape: f32[32,32], index: 6, kind: input, shape index: {}]   ;;  %s775_s7 = inlined_call_operand.vmem [shape: f32[1,32], index: 7, kind: input, shape index: {}]   ;;  %s776_s8 = inlined_call_operand.vmem [shape: f32[32,128], index: 8, kind: input, shape index: {}]   ;;  %s777_s9 = inlined_call_operand.vmem [shape: f32[64,32], index: 9, kind: input, shape index: {}]   ;;  %s778_s10 = inlined_call_operand.hbm [shape: f32[8,32], index: 10, kind: output, shape index: {0}]   ;;  %s779_s11 = inlined_call_operand.vmem [shape: f32[8,16], index: 11, kind: output, shape index: {1}]   ;;  %s780_s12 = inlined_call_operand.vmem [shape: f32[8,16], index: 12, kind: output, shape index: {2}]  }
   0x1   :  { %v614_v0 = vld [vmem:[%s768_s0] sm:$0xff] }
   0x2   :  { %v41_v1 = vmul.f32 %v614_v0, %v614_v0 }
   0x3   :  { %18 = vsyncpa [#allocation3], 0  ;;  %v535_v3 = vmov 32.0   ;;  %v73_v7 = vld [vmem:[%s773_s5 + $0x18] sm:$0xff]  ;;  %v72_v8 = vld [vmem:[%s773_s5 + $0x10] sm:$0xff]  ;;  %s536_s14 = smov 64  }
   0x4   :  { %v43_v2 = vsel %vm42_vm0, %v41_v1, 0.0  ;;  %483 = vrcp.f32 %v535_v3  ;;  %89 = vmatpush.msra.mxu0 %v73_v7  ;;  %v71_v9 = vld [vmem:[%s773_s5 + $0x8] sm:$0xff]  ;;  %v70_v11 = vld [vmem:[%s773_s5] sm:$0xff]  ;;  %s537_s15 = smov 120   ;;  %s539_s18 = smov 96   ;;  %vm131_vm5 = vcmask 64512  }
   0x5   :  { %44 = vadd.xlane.f32.xlu0 %v43_v2  ;;  %v99_v13 = vld [vmem:[%s771_s3] sm:$0xff]  ;;  %s540_s19 = smov 104   ;;  %vm114_vm6 = vcmask 130048   ;;  %v178_v42 = vld [vmem:[%s769_s1 + $0x8] sm:$0xff]  ;;  %v179_v51 = vld [vmem:[%s769_s1 + $0x10] sm:$0xff]  ;;  %s541_s27 = smov 80  }
   0x6   :  { %90 = vmatpush.msra.mxu0 %v72_v8  ;;  %v481_v24 = vld [vmem:[%s772_s4] ss:$0 sm:$0xff]  ;;  %s538_s4 = smov 112   ;;  %v180_v56 = vld [vmem:[%s769_s1 + $0x18] sm:$0xff]  ;;  %s543_s29 = smov 16   ;;  %vm287_vm7 = vcmask 195584  }
   0x7   :  { %v97_v31 = vld [vmem:[%s770_s2] sm:$0xff]  ;;  %s544_s30 = smov 24   ;;  %vm399_vm15 = vcmask 523264  }
   0x8   :  { %91 = vmatpush.msra.mxu0 %v71_v9  ;;  %v177_v43 = vld [vmem:[%s769_s1] sm:$0xff] }
   0xa   :  { %v484_v4 = vpop.eup %483  ;;  %92 = vmatpush.msra.mxu0 %v70_v11 }
   0xb   :  { %v47_v5 = vmul.f32 32.0, %v484_v4  ;;  %vm51_vm1 = vweird.f32 %v484_v4 }
   0xd   :  { %v48_v6 = vsub.f32 1.0, %v47_v5 }
   0xf   :  { %v49_v10 = vmul.f32 %v484_v4, %v48_v6 }
  0x11   :  { %v50_v12 = vadd.f32 %v484_v4, %v49_v10 }
  0x13   :  { %v635_v14 = vsel %vm51_vm1, %v484_v4, %v50_v12 }
  0x19   :  { %101 = vrot.lane.b32.xlu0 %v99_v13, %s536_s14 }
  0x78   :  { %v45_v15 = vpop.xlane.xlu0 %44 }
  0x79   :  { %v53_v16 = vmul.f32 %v635_v14, %v45_v15 }
  0x7b   :  { %v54_v17 = vadd.f32 1e-06, %v53_v16 }
  0x7d   :  { %485 = vrsqrt.f32 %v54_v17  ;;  %vm61_vm3 = vweird.f32 %v54_v17 }
  0x83   :  { %v486_v18 = vpop.eup %485 }
  0x84   :  { %v56_v19 = vmul.f32 %v486_v18, %v54_v17  ;;  %vm62_vm2 = vweird.f32 %v486_v18 }
  0x85   :  { %vm63_vm4 = vmor %vm61_vm3, %vm62_vm2 }
  0x86   :  { %v57_v20 = vmul.f32 %v486_v18, %v56_v19 }
  0x88   :  { %v58_v21 = vmul.f32 0.5, %v57_v20 }
  0x8a   :  { %v59_v22 = vsub.f32 1.5, %v58_v21 }
  0x8b   :  { %v102_v28 = vpop.permute.xlu0 %101 }
  0x8c   :  { %v60_v23 = vmul.f32 %v486_v18, %v59_v22 }
  0x8e   :  { %v64_v25 = vsel %vm63_vm4, %v486_v18, %v60_v23 }
  0x8f   :  { %v65_v26 = vmul.f32 %v64_v25, %v614_v0 }
  0x91   :  { %v69_v27 = vmul.f32 %v481_v24, %v65_v26 }
  0x93   :  { %449 = vmatmul.msk.f32.vlgmr.msra.gmra.mxu0 %vm42_vm0, %v69_v27 }
 0x110   :  { %v643_v29 = vpop.f32.mrf.mxu0 }
 0x111   :  { %v104_v30 = vmul.f32 %v102_v28, %v643_v29  ;;  %127 = vrot.lane.b32.xlu0 %v643_v29, %s537_s15  ;;  %v98_v32 = vmul.f32 %v97_v31, %v643_v29 }
 0x113   :  { %106 = vrot.lane.b32.xlu1 %v104_v30, %s536_s14 }
 0x183   :  { %v128_v60 = vpop.permute.xlu0 %127 }
 0x185   :  { %v107_v33 = vpop.permute.xlu1 %106 }
 0x186   :  { %v109_v34 = vadd.f32 %v107_v33, %v98_v32 }
 0x188   :  { %121 = vrot.lane.b32.xlu1 %v109_v34, %s537_s15 }
 0x190   :  { %123 = vrot.lane.b32.xlu1 %v109_v34, %s538_s4 }
 0x1fa   :  { %v122_v35 = vpop.permute.xlu1 %121 }
 0x1fb   :  { %129 = vrot.lane.b32.xlu2 %v122_v35, %s539_s18 }
 0x202   :  { %v124_v38 = vpop.permute.xlu1 %123 }
 0x203   :  { %111 = vrot.lane.b32.xlu2 %v109_v34, %s539_s18 }
 0x20b   :  { %125 = vrot.lane.b32.xlu2 %v109_v34, %s540_s19 }
 0x255   :  { %v130_v36 = vpop.permute.xlu2 %129 }
 0x256   :  { %450 = vmatpush.xpose.msk.msrb.mxu0 %vm131_vm5, %v130_v36  ;;  %466 = vmatpush.xpose.msk.msra.mxu1 %vm131_vm5, %v130_v36 }
 0x25a   :  { %451 = vmatpush.xpose.msk.msrb.mxu0 %vm131_vm5, %v130_v36  ;;  %467 = vmatpush.xpose.msk.msra.mxu1 %vm131_vm5, %v130_v36 }
 0x25d   :  { %v112_v37 = vpop.permute.xlu2 %111 }
 0x25e   :  { %452 = vmatpush.xpose.msk.msrb.mxu0 %vm131_vm5, %v112_v37  ;;  %468 = vmatpush.xpose.msk.msra.mxu1 %vm131_vm5, %v112_v37  ;;  %115 = vst.msk [vmem:[%s779_s11] sm:$0xff] %vm114_vm6, %v112_v37 }
 0x262   :  { %453 = vmatpush.xpose.msk.msrb.mxu0 %vm131_vm5, %v112_v37  ;;  %469 = vmatpush.xpose.msk.msra.mxu1 %vm131_vm5, %v112_v37  ;;  %v292_v37 = vld [vmem:[%s774_s6 + $0x18] sm:$0xff] }
 0x263   :  { %308 = vmatpush.msra.mxu3 %v292_v37 }
 0x265   :  { %454 = vmatmul.msk.f32.vlgmr.msrb.gmra.mxu0 %vm131_vm5, %v109_v34  ;;  %455 = vmatmul.msk.f32.vlgmr.msra.gmra.mxu1 %vm131_vm5, %v122_v35  ;;  %v126_v39 = vpop.permute.xlu2 %125 }
 0x26d   :  { %456 = vmatmul.msk.f32.gmra.mxu1 %vm131_vm5, %v124_v38  ;;  %v291_v38 = vld [vmem:[%s774_s6 + $0x10] sm:$0xff] }
 0x26e   :  { %309 = vmatpush.msra.mxu3 %v291_v38 }
 0x275   :  { %457 = vmatmul.msk.f32.gmra.mxu1 %vm131_vm5, %v126_v39  ;;  %v290_v39 = vld [vmem:[%s774_s6 + $0x8] sm:$0xff] }
 0x276   :  { %310 = vmatpush.msra.mxu3 %v290_v39 }
 0x2e2   :  { %v161_v40 = vpop.f32.mrf.mxu0  ;;  %v164_v41 = vpop.f32.mrf.mxu1 }
 0x2e3   :  { %v173_v44 = vmul.f32 0.35355338, %v161_v40  ;;  %v174_v45 = vmul.f32 0.35355338, %v164_v41  ;;  %v289_v40 = vld [vmem:[%s774_s6] sm:$0xff]  ;;  %s432_s6 = sshll.u32 %s778_s10, 4  ;;  %s433_s6 = int_to_ptr.hbm [resolvable:$true] %s432_s6 }
 0x2e4   :  { %311 = vmatpush.msra.mxu3 %v289_v40 }
 0x2e5   :  { %v182_v46 = vadd.f32 %v178_v42, %v174_v45  ;;  %v181_v47 = vadd.f32 %v177_v43, %v173_v44 }
 0x2e7   :  { %v188_v48 = vsel %vm42_vm0, %v182_v46, -inf  ;;  %v185_v49 = vsel %vm42_vm0, %v181_v47, -inf }
 0x2e8   :  { %189 = vmax.xlane.f32.xlu2 %v188_v48  ;;  %186 = vmax.xlane.f32.xlu1 %v185_v49 }
 0x2ea   :  { %v167_v50 = vpop.f32.mrf.mxu1 }
 0x2eb   :  { %v175_v52 = vmul.f32 0.35355338, %v167_v50 }
 0x2ed   :  { %v183_v53 = vadd.f32 %v179_v51, %v175_v52  ;;  %v342_v51 = vld [vmem:[%s776_s8 + $0x18] sm:$0xff]  ;;  %v341_v52 = vld [vmem:[%s776_s8 + $0x10] sm:$0xff] }
 0x2ee   :  { %358 = vmatpush.msra.mxu0 %v342_v51 }
 0x2ef   :  { %v191_v54 = vsel %vm42_vm0, %v183_v53, -inf }
 0x2f0   :  { %192 = vmax.xlane.f32.xlu0 %v191_v54  ;;  %359 = vmatpush.msra.mxu0 %v341_v52 }
 0x2f2   :  { %v170_v55 = vpop.f32.mrf.mxu1 }
 0x2f3   :  { %v176_v57 = vmul.f32 0.35355338, %v170_v55 }
 0x2f5   :  { %v184_v58 = vadd.f32 %v180_v56, %v176_v57 }
 0x2f7   :  { %v194_v59 = vsel %vm42_vm0, %v184_v58, -inf }
 0x2f8   :  { %195 = vmax.xlane.f32.xlu2 %v194_v59 }
 0x310   :  { %229 = vrot.lane.b32.xlu2 %v128_v60, %s541_s27 }
 0x35b   :  { %v187_v61 = vpop.xlane.xlu1 %186  ;;  %v190_v62 = vpop.xlane.xlu2 %189 }
 0x35c   :  { %v197_v63 = vsub.f32 %v181_v47, %v187_v61  ;;  %v198_v1 = vsub.f32 %v182_v46, %v190_v62 }
 0x35e   :  { %v201_v2 = vmul.f32 1.442695, %v197_v63  ;;  %v203_v3 = vmul.f32 1.442695, %v198_v1  ;;  %v482_v63 = vld [vmem:[%s775_s7] ss:$0 sm:$0xff] }
 0x360   :  { %487 = vpow2.f32 %v201_v2 }
 0x361   :  { %489 = vpow2.f32 %v203_v3 }
 0x363   :  { %v193_v4 = vpop.xlane.xlu0 %192 }
 0x364   :  { %v199_v5 = vsub.f32 %v183_v53, %v193_v4  ;;  %v339_v53 = vld [vmem:[%s776_s8] sm:$0xff]  ;;  %v397_v4 = vld [vmem:[%s777_s9 + $0x30] sm:$0xff] }
 0x366   :  { %v488_v6 = vpop.eup %487  ;;  %v205_v7 = vmul.f32 1.442695, %v199_v5  ;;  %v396_v5 = vld [vmem:[%s777_s9 + $0x28] sm:$0xff] }
 0x367   :  { %v490_v8 = vpop.eup %489  ;;  %v209_v9 = vsel %vm42_vm0, %v488_v6, 0.0 }
 0x368   :  { %491 = vpow2.f32 %v205_v7  ;;  %210 = vadd.xlane.f32.xlu1 %v209_v9  ;;  %v212_v10 = vsel %vm42_vm0, %v490_v8, 0.0  ;;  %v395_v7 = vld [vmem:[%s777_s9 + $0x20] sm:$0xff]  ;;  %v393_v9 = vld [vmem:[%s777_s9 + $0x10] sm:$0xff] }
 0x369   :  { %213 = vadd.xlane.f32.xlu0 %v212_v10  ;;  %v392_v10 = vld [vmem:[%s777_s9 + $0x8] sm:$0xff] }
 0x36b   :  { %v196_v11 = vpop.xlane.xlu2 %195 }
 0x36c   :  { %v200_v12 = vsub.f32 %v184_v58, %v196_v11 }
 0x36e   :  { %v492_v13 = vpop.eup %491  ;;  %v207_v15 = vmul.f32 1.442695, %v200_v12 }
 0x36f   :  { %v215_v16 = vsel %vm42_vm0, %v492_v13, 0.0 }
 0x370   :  { %493 = vpow2.f32 %v207_v15  ;;  %v391_v15 = vld [vmem:[%s777_s9] sm:$0xff] }
 0x371   :  { %216 = vadd.xlane.f32.xlu0 %v215_v16 }
 0x373   :  { %v230_v17 = vpop.permute.xlu2 %229 }
 0x374   :  { %256 = vmatpush.msra.mxu2 %v230_v17 }
 0x376   :  { %v494_v18 = vpop.eup %493  ;;  %257 = vmatpush.msra.mxu2 %v230_v17 }
 0x377   :  { %v218_v19 = vsel %vm42_vm0, %v494_v18, 0.0 }
 0x379   :  { %219 = vadd.xlane.f32.xlu0 %v218_v19 }
 0x381   :  { %117 = vrot.lane.b32.xlu1 %v643_v29, %s541_s27 }
 0x3db   :  { %v211_v20 = vpop.xlane.xlu1 %210 }
 0x3dc   :  { %495 = vrcp.f32 %v211_v20  ;;  %v214_v21 = vpop.xlane.xlu0 %213 }
 0x3dd   :  { %497 = vrcp.f32 %v214_v21 }
 0x3e2   :  { %v496_v22 = vpop.eup %495 }
 0x3e3   :  { %v225_v24 = vmul.f32 %v496_v22, %v488_v6  ;;  %v498_v26 = vpop.eup %497 }
 0x3e4   :  { %v217_v25 = vpop.xlane.xlu0 %216  ;;  %v226_v27 = vmul.f32 %v498_v26, %v490_v8  ;;  %v394_v8 = vld [vmem:[%s777_s9 + $0x18] sm:$0xff] }
 0x3e5   :  { %499 = vrcp.f32 %v217_v25 }
 0x3eb   :  { %v500_v29 = vpop.eup %499 }
 0x3ec   :  { %v220_v28 = vpop.xlane.xlu0 %219  ;;  %v227_v30 = vmul.f32 %v500_v29, %v492_v13 }
 0x3ed   :  { %501 = vrcp.f32 %v220_v28 }
 0x3f3   :  { %v118_v23 = vpop.permute.xlu1 %117  ;;  %v502_v31 = vpop.eup %501 }
 0x3f4   :  { %120 = vst.msk [vmem:[%s780_s12] sm:$0xff] %vm114_vm6, %v118_v23  ;;  %258 = vmatpush.msra.mxu2 %v118_v23  ;;  %v228_v32 = vmul.f32 %v502_v31, %v494_v18  ;;  %s542_s12 = smov 8  }
 0x3f6   :  { %259 = vmatpush.msra.mxu2 %v118_v23 }
 0x3f7   :  { %458 = vmatmul.msk.f32.vlgmr.msra.gmra.mxu2 %vm42_vm0, %v225_v24 }
 0x3ff   :  { %459 = vmatmul.msk.f32.gmra.mxu2 %vm42_vm0, %v226_v27 }
 0x407   :  { %460 = vmatmul.msk.f32.gmra.mxu2 %vm42_vm0, %v227_v30 }
 0x40f   :  { %461 = vmatmul.msk.f32.gmra.mxu2 %vm42_vm0, %v228_v32 }
 0x47a   :  { %v261_v33 = vpop.f32.mrf.mxu2 }
 0x482   :  { %v264_v34 = vpop.f32.mrf.mxu2 }
 0x483   :  { %274 = vrot.lane.b32.xlu2 %v264_v34, %s542_s12 }
 0x48a   :  { %v267_v35 = vpop.f32.mrf.mxu2 }
 0x48b   :  { %278 = vrot.lane.b32.xlu1 %v267_v35, %s543_s29 }
 0x492   :  { %v270_v36 = vpop.f32.mrf.mxu2 }
 0x493   :  { %282 = vrot.lane.b32.xlu0 %v270_v36, %s544_s30 }
 0x4dd   :  { %v275_v41 = vpop.permute.xlu2 %274 }
 0x4de   :  { %v285_v43 = vsel %vm131_vm5, %v261_v33, %v275_v41 }
 0x4fd   :  { %v279_v42 = vpop.permute.xlu1 %278 }
 0x4fe   :  { %v286_v44 = vsel %vm114_vm6, %v285_v43, %v279_v42 }
 0x505   :  { %v283_v45 = vpop.permute.xlu0 %282 }
 0x506   :  { %v288_v46 = vsel %vm287_vm7, %v286_v44, %v283_v45 }
 0x507   :  { %462 = vmatmul.msk.f32.vlgmr.msra.gmra.mxu3 %vm42_vm0, %v288_v46 }
 0x58a   :  { %v313_v47 = vpop.f32.mrf.mxu3 }
 0x58b   :  { %v715_v48 = vadd.f32 %v313_v47, %v614_v0  ;;  %v340_v0 = vld [vmem:[%s776_s8 + $0x8] sm:$0xff] }
 0x58c   :  { %360 = vmatpush.msra.mxu0 %v340_v0 }
 0x58d   :  { %v318_v49 = vmul.f32 %v715_v48, %v715_v48 }
 0x58e   :  { %361 = vmatpush.msra.mxu0 %v339_v53 }
 0x58f   :  { %v319_v50 = vsel %vm42_vm0, %v318_v49, 0.0 }
 0x590   :  { %320 = vadd.xlane.f32.xlu2 %v319_v50 }
 0x603   :  { %v321_v54 = vpop.xlane.xlu2 %320 }
 0x604   :  { %v322_v55 = vmul.f32 %v321_v54, %v635_v14  ;;  %v398_v14 = vld [vmem:[%s777_s9 + $0x38] sm:$0xff]  ;;  %s545_s9 = smov [#allocation2]  }
 0x605   :  { %411 = vmatpush.msrb.mxu3 %v398_v14  ;;  %s430_s17 = sshll.u32 %s545_s9, 4  ;;  %s431_s17 = int_to_ptr.vmem [resolvable:$true] %s430_s17 }
 0x606   :  { %v323_v56 = vadd.f32 1e-06, %v322_v55 }
 0x607   :  { %412 = vmatpush.msrb.mxu3 %v397_v4 }
 0x608   :  { %503 = vrsqrt.f32 %v323_v56  ;;  %vm330_vm9 = vweird.f32 %v323_v56 }
 0x609   :  { %413 = vmatpush.msrb.mxu3 %v396_v5 }
 0x60b   :  { %414 = vmatpush.msrb.mxu3 %v395_v7 }
 0x60d   :  { %415 = vmatpush.msrb.mxu3 %v394_v8 }
 0x60e   :  { %v504_v57 = vpop.eup %503 }
 0x60f   :  { %v325_v58 = vmul.f32 %v504_v57, %v323_v56  ;;  %vm331_vm8 = vweird.f32 %v504_v57  ;;  %416 = vmatpush.msrb.mxu3 %v393_v9 }
 0x610   :  { %vm332_vm10 = vmor %vm330_vm9, %vm331_vm8 }
 0x611   :  { %v326_v59 = vmul.f32 %v504_v57, %v325_v58  ;;  %417 = vmatpush.msrb.mxu3 %v392_v10 }
 0x613   :  { %v327_v60 = vmul.f32 0.5, %v326_v59  ;;  %418 = vmatpush.msrb.mxu3 %v391_v15 }
 0x615   :  { %v328_v61 = vsub.f32 1.5, %v327_v60 }
 0x617   :  { %v329_v62 = vmul.f32 %v504_v57, %v328_v61 }
 0x619   :  { %v333_v1 = vsel %vm332_vm10, %v504_v57, %v329_v62 }
 0x61a   :  { %v334_v2 = vmul.f32 %v333_v1, %v715_v48 }
 0x61c   :  { %v338_v3 = vmul.f32 %v482_v63, %v334_v2 }
 0x61e   :  { %463 = vmatmul.msk.f32.vlgmr.msra.gmra.mxu0 %vm42_vm0, %v338_v3 }
 0x69b   :  { %v363_v6 = vpop.f32.mrf.mxu0 }
 0x69c   :  { %387 = vrot.lane.b32.xlu1 %v363_v6, %s536_s14  ;;  %v464_v11 = vmul.f32 -1.442695, %v363_v6 }
 0x69e   :  { %505 = vpow2.f32 %v464_v11 }
 0x6a4   :  { %v506_v12 = vpop.eup %505 }
 0x6a5   :  { %v369_v13 = vadd.f32 1.0, %v506_v12 }
 0x6a7   :  { %507 = vrcp.f32 %v369_v13  ;;  %v381_v21 = vand.u32 2147483648, %v369_v13  ;;  %vm375_vm12 = vweird.f32 %v369_v13  ;;  %v379_v22 = vand.u32 2147483647, %v369_v13 }
 0x6a9   :  { %v382_v24 = vor.u32 1.1754944e-38, %v381_v21  ;;  %vm380_vm14 = vcmp.eq.f32.partialorder %v379_v22, 8.507059e+37 }
 0x6ad   :  { %v508_v16 = vpop.eup %507 }
 0x6ae   :  { %v371_v17 = vmul.f32 %v508_v16, %v369_v13  ;;  %vm376_vm11 = vweird.f32 %v508_v16 }
 0x6af   :  { %vm377_vm13 = vmor %vm375_vm12, %vm376_vm11 }
 0x6b0   :  { %v372_v18 = vsub.f32 1.0, %v371_v17 }
 0x6b2   :  { %v373_v19 = vmul.f32 %v508_v16, %v372_v18 }
 0x6b4   :  { %v374_v20 = vadd.f32 %v508_v16, %v373_v19 }
 0x6b6   :  { %v378_v23 = vsel %vm377_vm13, %v508_v16, %v374_v20 }
 0x6b7   :  { %v383_v25 = vsel %vm380_vm14, %v382_v24, %v378_v23 }
 0x6b8   :  { %v385_v26 = vmul.f32 %v383_v25, %v363_v6 }
 0x70e   :  { %v388_v27 = vpop.permute.xlu1 %387 }
 0x70f   :  { %v390_v28 = vmul.f32 %v388_v27, %v385_v26 }
 0x711   :  { %465 = vmatmul.msk.f32.vlgmr.msrb.gmra.mxu3 %vm399_vm15, %v390_v28 }
 0x794   :  { %v420_v29 = vpop.f32.mrf.mxu3 }
 0x795   :  { %v423_v30 = vadd.f32 %v420_v29, %v715_v48 }
 0x797   :  { %424 = vst.msk [vmem:[#allocation2] sm:$0xff] %vm42_vm0, %v423_v30 }
 0x798   :  { %435 = dma.vmem_to_hbm [thread:$0]  %s431_s17, 128, %s433_s6, [#allocation3]  }
 0x799   :  { %533 = dma.done.wait [#allocation3], 128  }
 0x79a   :  { %534 = vsyncadd [#allocation3], 4294967168 }
 0x79b   :  { %448 = vsyncpa [#allocation3], 1 }

</bundles_post_ra>
